<compile_context>
chip_gen: v7x
topology: tpu7x:2x2x1
jax: 0.10.0
libtpu: 0.0.40
codegen_flags: <defaults>
</compile_context>

<pallas_src>
import jax
import jax.numpy as jnp
import numpy as np
from jax.experimental import pallas as pl
from jax.experimental.pallas import tpu as pltpu


# ----------------------------- Pallas kernels -------------------------------
def gcn1_kernel(a_ref, x_ref, w1_ref, b1_ref, w2_ref, hw2_ref):
    """Per node-row block: HW2 = (ReLU((A_blk @ X) @ W1 + b1)) @ W2."""
    f32 = jnp.float32
    ax = jnp.dot(a_ref[...], x_ref[...], preferred_element_type=f32)        # [tm, Fp]
    h1 = jnp.dot(ax, w1_ref[...], preferred_element_type=f32) + b1_ref[...]
    h1 = jnp.maximum(h1, 0.0)                                               # GCNConv1 + ReLU
    hw2_ref[...] = jnp.dot(h1, w2_ref[...],
                           preferred_element_type=f32).astype(hw2_ref.dtype)


def gcn2_pool_reg_kernel(a_ref, hw2_ref, b2_ref, pool_ref,
                         rw1_ref, rb1_ref, rw2_ref, rb2_ref,
                         rw3_ref, rb3_ref, rw4_ref, rb4_ref,
                         out_ref, acc_ref):
    """Per node-row block: H2 = ReLU(A_blk @ HW2 + b2); pooled += pool_blk @ H2.
    On the last block, run the regressor MLP and write the lane-dense output slab."""
    f32 = jnp.float32
    i = pl.program_id(0)

    @pl.when(i == 0)
    def _():
        acc_ref[...] = jnp.zeros_like(acc_ref)

    h2 = jnp.dot(a_ref[...], hw2_ref[...], preferred_element_type=f32) + b2_ref[...]
    h2 = jnp.maximum(h2, 0.0)                                               # GCNConv2 + ReLU
    # F.dropout(p=0.5, training=False) is identity in eval mode.
    # TODO(synk): training-mode dropout would need pltpu.prng_seed / prng_random_bits.
    acc_ref[...] += jnp.dot(pool_ref[...], h2, preferred_element_type=f32)  # global_add_pool

    @pl.when(i == pl.num_programs(0) - 1)
    def _():
        g = acc_ref[...]
        g = jnp.maximum(jnp.dot(g, rw1_ref[...], preferred_element_type=f32) + rb1_ref[...], 0.0)
        g = jnp.maximum(jnp.dot(g, rw2_ref[...], preferred_element_type=f32) + rb2_ref[...], 0.0)
        g = jnp.maximum(jnp.dot(g, rw3_ref[...], preferred_element_type=f32) + rb3_ref[...], 0.0)
        out_ref[...] = jnp.dot(g, rw4_ref[...], preferred_element_type=f32) + rb4_ref[...]


# ------------------------------ wrapper --------------------------------------
def gnn_forward(x_pad, a_pad, pool_pad, kparams, *, tm=128):
    (w1, b1, w2, b2, rw1, rb1, rw2, rb2, rw3, rb3, rw4p, rb4p) = kparams
    Np, Fp = x_pad.shape
    G = pool_pad.shape[0]
    assert Np % tm == 0 and a_pad.shape == (Np, Np) and pool_pad.shape == (G, Np)
    nblk = Np // tm
    vmem_limit = 32 * 1024 * 1024  # fits v5e/v6e/v7x scoped VMEM

    # bf16 for the dominant [N,N] operand (and X to keep the dot homogeneous);
    # accumulation stays f32 via preferred_element_type on the MXU.
    a_bf = a_pad.astype(jnp.bfloat16)
    x_bf = x_pad.astype(jnp.bfloat16)

    # ---- kernel 1: GCN layer 1 (with layer-2 weight folded in) ------------
    k1_cost = pl.CostEstimate(
        flops=int(2 * Np * Np * Fp + 2 * Np * Fp * 64 + 2 * Np * 64 * 32),
        transcendentals=0,
        bytes_accessed=int(2 * Np * Np + 2 * Np * Fp
                           + 4 * (Fp * 64 + 64 + 64 * 32) + 2 * Np * 32))
    hw2 = pl.pallas_call(
        gcn1_kernel,
        out_shape=jax.ShapeDtypeStruct((Np, 32), jnp.bfloat16),
        grid_spec=pltpu.PrefetchScalarGridSpec(
            num_scalar_prefetch=0,
            grid=(nblk,),
            in_specs=[
                pl.BlockSpec((tm, Np), lambda i: (i, 0)),   # A_hat row tile (bf16, streamed)
                pl.BlockSpec((Np, Fp), lambda i: (0, 0)),   # X (resident)
                pl.BlockSpec((Fp, 64), lambda i: (0, 0)),   # W1 (padded rows)
                pl.BlockSpec((1, 64), lambda i: (0, 0)),    # b1
                pl.BlockSpec((64, 32), lambda i: (0, 0)),   # W2
            ],
            out_specs=pl.BlockSpec((tm, 32), lambda i: (i, 0)),
        ),
        compiler_params=pltpu.CompilerParams(
            dimension_semantics=("parallel",),              # megacore on v7x
            vmem_limit_bytes=vmem_limit),
        cost_estimate=k1_cost,
    )(a_bf, x_bf, w1, b1, w2)

    # ---- kernel 2: GCN layer 2 + global_add_pool + regressor MLP ----------
    reg_flops = 2 * G * (32 * 32 + 32 * 16 + 16 * 8 + 8 * 128)
    k2_cost = pl.CostEstimate(
        flops=int(2 * Np * Np * 32 + 2 * G * Np * 32 + reg_flops),
        transcendentals=0,
        bytes_accessed=int(2 * Np * Np + 2 * Np * 32 + 4 * G * Np
                           + 4 * G * 128 + 4 * 4096))
    out_pad = pl.pallas_call(
        gcn2_pool_reg_kernel,
        out_shape=jax.ShapeDtypeStruct((G, 128), jnp.float32),
        grid_spec=pltpu.PrefetchScalarGridSpec(
            num_scalar_prefetch=0,
            grid=(nblk,),
            in_specs=[
                pl.BlockSpec((tm, Np), lambda i: (i, 0)),   # A_hat row tile (bf16, streamed)
                pl.BlockSpec((Np, 32), lambda i: (0, 0)),   # HW2 (resident)
                pl.BlockSpec((1, 32), lambda i: (0, 0)),    # b2
                pl.BlockSpec((G, tm), lambda i: (0, i)),    # pool column tile
                pl.BlockSpec((32, 32), lambda i: (0, 0)),   # regressor lin1
                pl.BlockSpec((1, 32), lambda i: (0, 0)),
                pl.BlockSpec((32, 16), lambda i: (0, 0)),   # regressor lin2
                pl.BlockSpec((1, 16), lambda i: (0, 0)),
                pl.BlockSpec((16, 8), lambda i: (0, 0)),    # regressor lin3
                pl.BlockSpec((1, 8), lambda i: (0, 0)),
                pl.BlockSpec((8, 128), lambda i: (0, 0)),   # regressor lin4 (lane-padded)
                pl.BlockSpec((1, 128), lambda i: (0, 0)),
            ],
            out_specs=pl.BlockSpec((G, 128), lambda i: (0, 0)),
            scratch_shapes=[pltpu.VMEM((G, 32), jnp.float32)],
        ),
        compiler_params=pltpu.CompilerParams(
            dimension_semantics=("arbitrary",),             # pooled sum accumulates over blocks
            vmem_limit_bytes=vmem_limit),
        cost_estimate=k2_cost,
    )(a_bf, hw2, b2, pool_pad, rw1, rb1, rw2, rb2, rw3, rb3, rw4p, rb4p)

    return out_pad[:, :1]   # real regressor output lives in lane 0


# ------------------------------ glue (plain JAX) -----------------------------
def build_a_hat(edge_index, num_nodes):
    """Dense GCN-normalized adjacency: D^-1/2 (A + I) D^-1/2."""
    src, dst = edge_index[0], edge_index[1]
    A = jnp.zeros((num_nodes, num_nodes), jnp.float32).at[dst, src].add(1.0)
    A = jnp.minimum(A, 1.0)                 # coalesce duplicate edges (guard for real data)
    A = A + jnp.eye(num_nodes, dtype=jnp.float32)
    deg = A.sum(axis=1)
    d = jnp.where(deg > 0, jax.lax.rsqrt(deg), 0.0)
    return d[:, None] * A * d[None, :]


def build_pool(batch, num_graphs):
    """One-hot [G, N] pooling matrix for global_add_pool."""
    return (batch[None, :] == jnp.arange(num_graphs)[:, None]).astype(jnp.float32)


def init_params(key):
    # conv1: 47->64, conv2: 64->32, regressor: 32->32->16->8->1
    layer_dims = [(47, 64), (64, 32), (32, 32), (32, 16), (16, 8), (8, 1)]
    params = []
    for fin, fout in layer_dims:
        key, kw, kb = jax.random.split(key, 3)
        scale = 1.0 / np.sqrt(fin)
        W = jax.random.uniform(kw, (fin, fout), jnp.float32, -scale, scale)
        b = jax.random.uniform(kb, (1, fout), jnp.float32, -scale, scale)
        params += [W, b]
    return tuple(params)


def pad2(x, shape):
    return jnp.pad(x, [(0, s - d) for d, s in zip(x.shape, shape)])


def pad_params_for_kernel(params, f_pad, out_lanes=128):
    w1, b1, w2, b2, rw1, rb1, rw2, rb2, rw3, rb3, rw4, rb4 = params
    w1p = pad2(w1, (f_pad, 64))          # zero rows for the padded input features
    rw4p = pad2(rw4, (8, out_lanes))     # lane-dense final layer; extra lanes are exact zeros
    rb4p = pad2(rb4, (1, out_lanes))
    return (w1p, b1, w2, b2, rw1, rb1, rw2, rb2, rw3, rb3, rw4p, rb4p)


def reference(x, a_hat, pool, params):
    """Pure-JAX forward mirroring the kernel's bf16 cast points (f32 accumulation)."""
    w1, b1, w2, b2, rw1, rb1, rw2, rb2, rw3, rb3, rw4, rb4 = params
    hi = jax.lax.Precision.HIGHEST
    f32, bf = jnp.float32, jnp.bfloat16
    a = a_hat.astype(bf).astype(f32)
    xb = x.astype(bf).astype(f32)
    h1 = jnp.maximum(jnp.dot(jnp.dot(a, xb, precision=hi), w1, precision=hi) + b1, 0.0)
    hw2 = jnp.dot(h1, w2, precision=hi).astype(bf).astype(f32)
    h2 = jnp.maximum(jnp.dot(a, hw2, precision=hi) + b2, 0.0)
    g = jnp.dot(pool, h2, precision=hi)
    g = jnp.maximum(jnp.dot(g, rw1, precision=hi) + rb1, 0.0)
    g = jnp.maximum(jnp.dot(g, rw2, precision=hi) + rb2, 0.0)
    g = jnp.maximum(jnp.dot(g, rw3, precision=hi) + rb3, 0.0)
    return jnp.dot(g, rw4, precision=hi) + rb4


if __name__ == "__main__":
    # Deterministic example: 8 graphs x 40 nodes each, 47 input features.
    G, nodes_per_graph, F = 8, 40, 47
    N = G * nodes_per_graph                # 320 nodes
    TM = 128                               # node-row tile
    Fp = 128                               # feature dim padded 47 -> 128 (lane aligned)
    Np = pl.cdiv(N, TM) * TM               # 384 -> 3 row tiles (real grid, pipelined)

    key = jax.random.PRNGKey(0)
    k_x, k_p = jax.random.split(key)
    x = jax.random.normal(k_x, (N, F), jnp.float32)

    # Deterministic undirected ring inside each graph.
    edges = []
    for g in range(G):
        off = g * nodes_per_graph
        for i in range(nodes_per_graph):
            j = (i + 1) % nodes_per_graph
            edges.append((off + i, off + j))
            edges.append((off + j, off + i))
    edge_index = jnp.asarray(np.array(edges, dtype=np.int32).T)            # [2, E]
    batch = jnp.asarray(np.repeat(np.arange(G, dtype=np.int32), nodes_per_graph))

    a_hat = build_a_hat(edge_index, N)
    pool = build_pool(batch, G)
    params = init_params(k_p)

    # Zero-pad nodes/features for clean (8,128) tiling; padded nodes have zero
    # adjacency rows/cols and zero pool weight, so they cannot affect the output.
    x_pad = pad2(x, (Np, Fp))
    a_pad = pad2(a_hat, (Np, Np))
    pool_pad = pad2(pool, (G, Np))
    kparams = pad_params_for_kernel(params, Fp)

    out = gnn_forward(x_pad, a_pad, pool_pad, kparams, tm=TM)
    out = jax.block_until_ready(out)

    ref = reference(x, a_hat, pool, params)
    assert out.shape == (G, 1)
    np.testing.assert_allclose(np.asarray(out), np.asarray(ref), rtol=3e-2, atol=3e-2)
    print("KERNEL_OK")
</pallas_src>

<mosaic_0001>
module attributes {stable_mosaic.version = 11 : i64} {
  func.func @gcn1_kernel(%arg0: i32, %arg1: memref<128x384xbf16, #tpu.memory_space<vmem>>, %arg2: memref<384x128xbf16, #tpu.memory_space<vmem>>, %arg3: memref<128x64xf32, #tpu.memory_space<vmem>>, %arg4: memref<1x64xf32, #tpu.memory_space<vmem>>, %arg5: memref<64x32xf32, #tpu.memory_space<vmem>>, %arg6: memref<128x32xbf16, #tpu.memory_space<vmem>>) attributes {dimension_semantics = [#tpu.dimension_semantics<parallel>], iteration_bounds = array<i64: 3>, scalar_prefetch = 0 : i64, scratch_operands = 0 : i64, tpu.core_type = #tpu.core_type<tc>, window_params = [{transform_indices = @transform_0, window_bounds = array<i64: 128, 384>}, {pipeline_mode = #tpu.pipeline_mode<synchronous>, transform_indices = @transform_1, window_bounds = array<i64: 384, 128>}, {pipeline_mode = #tpu.pipeline_mode<synchronous>, transform_indices = @transform_2, window_bounds = array<i64: 128, 64>}, {pipeline_mode = #tpu.pipeline_mode<synchronous>, transform_indices = @transform_3, window_bounds = array<i64: 1, 64>}, {pipeline_mode = #tpu.pipeline_mode<synchronous>, transform_indices = @transform_4, window_bounds = array<i64: 64, 32>}, {transform_indices = @transform_5, window_bounds = array<i64: 128, 32>}]} {
    %c0 = arith.constant 0 : index
    %c0_0 = arith.constant 0 : index
    %0 = vector.load %arg1[%c0, %c0_0] : memref<128x384xbf16, #tpu.memory_space<vmem>>, vector<128x384xbf16>
    %c0_1 = arith.constant 0 : index
    %c0_2 = arith.constant 0 : index
    %1 = vector.load %arg2[%c0_1, %c0_2] : memref<384x128xbf16, #tpu.memory_space<vmem>>, vector<384x128xbf16>
    %cst = arith.constant dense<0.000000e+00> : vector<128x128xf32>
    %2 = tpu.matmul %0, %1, %cst {dimension_numbers = #tpu.dot_dimension_numbers<[1], [0], [0], [1], [0, 0, 1, 1], [], []>} : vector<128x384xbf16>, vector<384x128xbf16>, vector<128x128xf32> -> vector<128x128xf32>
    %c0_3 = arith.constant 0 : index
    %c0_4 = arith.constant 0 : index
    %3 = vector.load %arg3[%c0_3, %c0_4] : memref<128x64xf32, #tpu.memory_space<vmem>>, vector<128x64xf32>
    %cst_5 = arith.constant dense<0.000000e+00> : vector<128x64xf32>
    %4 = tpu.matmul %2, %3, %cst_5 {dimension_numbers = #tpu.dot_dimension_numbers<[1], [0], [0], [1], [0, 0, 1, 1], [], []>} : vector<128x128xf32>, vector<128x64xf32>, vector<128x64xf32> -> vector<128x64xf32>
    %c0_6 = arith.constant 0 : index
    %c0_7 = arith.constant 0 : index
    %5 = vector.load %arg4[%c0_6, %c0_7] : memref<1x64xf32, #tpu.memory_space<vmem>>, vector<1x64xf32>
    %6 = vector.broadcast %5 : vector<1x64xf32> to vector<128x64xf32>
    %7 = arith.addf %4, %6 : vector<128x64xf32>
    %cst_8 = arith.constant 0.000000e+00 : f32
    %8 = vector.broadcast %cst_8 : f32 to vector<128x64xf32>
    %9 = arith.maximumf %7, %8 : vector<128x64xf32>
    %c0_9 = arith.constant 0 : index
    %c0_10 = arith.constant 0 : index
    %10 = vector.load %arg5[%c0_9, %c0_10] : memref<64x32xf32, #tpu.memory_space<vmem>>, vector<64x32xf32>
    %cst_11 = arith.constant dense<0.000000e+00> : vector<128x32xf32>
    %11 = tpu.matmul %9, %10, %cst_11 {dimension_numbers = #tpu.dot_dimension_numbers<[1], [0], [0], [1], [0, 0, 1, 1], [], []>} : vector<128x64xf32>, vector<64x32xf32>, vector<128x32xf32> -> vector<128x32xf32>
    %12 = arith.truncf %11 : vector<128x32xf32> to vector<128x32xbf16>
    %c0_12 = arith.constant 0 : index
    %c0_13 = arith.constant 0 : index
    %13 = vector.load %arg6[%c0_12, %c0_13] : memref<128x32xbf16, #tpu.memory_space<vmem>>, vector<128x32xbf16>
    tpu.vector_store %arg6[%c0_12, %c0_13], %12 {strides = array<i32>} : memref<128x32xbf16, #tpu.memory_space<vmem>>, vector<128x32xbf16>,
    return
  }
  func.func @transform_0(%arg0: i32) -> (i32, i32) {
    %c0_i32 = arith.constant 0 : i32
    %c0_i32_0 = arith.constant 0 : i32
    return %arg0, %c0_i32 : i32, i32
  }
  func.func @transform_1(%arg0: i32) -> (i32, i32) {
    %c0_i32 = arith.constant 0 : i32
    %c0_i32_0 = arith.constant 0 : i32
    %c0_i32_1 = arith.constant 0 : i32
    return %c0_i32, %c0_i32_0 : i32, i32
  }
  func.func @transform_2(%arg0: i32) -> (i32, i32) {
    %c0_i32 = arith.constant 0 : i32
    %c0_i32_0 = arith.constant 0 : i32
    %c0_i32_1 = arith.constant 0 : i32
    return %c0_i32, %c0_i32_0 : i32, i32
  }
  func.func @transform_3(%arg0: i32) -> (i32, i32) {
    %c0_i32 = arith.constant 0 : i32
    %c0_i32_0 = arith.constant 0 : i32
    %c0_i32_1 = arith.constant 0 : i32
    return %c0_i32, %c0_i32_0 : i32, i32
  }
  func.func @transform_4(%arg0: i32) -> (i32, i32) {
    %c0_i32 = arith.constant 0 : i32
    %c0_i32_0 = arith.constant 0 : i32
    %c0_i32_1 = arith.constant 0 : i32
    return %c0_i32, %c0_i32_0 : i32, i32
  }
  func.func @transform_5(%arg0: i32) -> (i32, i32) {
    %c0_i32 = arith.constant 0 : i32
    %c0_i32_0 = arith.constant 0 : i32
    return %arg0, %c0_i32 : i32, i32
  }
}

</mosaic_0001>

<bundles_post_ra>
// kernel: tpu_custom_call.1
= control target key start
LH: loop header
LB: loop body
LE: loop exit
PB: predicated region body
PF: predicated region fallthrough
CT: control target
= control target key end

     0   :  { %10 = vsyncpa [#allocation3], 0  ;;  %s2287_s0 = inlined_call_operand.hbm [shape: bf16[384,384], index: 0, kind: input, shape index: {}]   ;;  %s2288_s1 = inlined_call_operand.vmem [shape: bf16[384,128], index: 1, kind: input, shape index: {}]   ;;  %s2289_s2 = inlined_call_operand.vmem [shape: f32[128,64], index: 2, kind: input, shape index: {}]   ;;  %s2290_s3 = inlined_call_operand.vmem [shape: f32[1,64], index: 3, kind: input, shape index: {}]   ;;  %s2291_s4 = inlined_call_operand.vmem [shape: f32[64,32], index: 4, kind: input, shape index: {}]   ;;  %s2292_s5 = inlined_call_operand.vmem [shape: bf16[384,32], index: 5, kind: output, shape index: {}]  }
   0x1   :  { %12 = vsyncpa [#allocation3 + $0x1], 0  ;;  %s1957_s18 = smov 0   ;;  %s1959_s19 = smov 0  }
   0x2   :  { %s1961_s20 = smov 0   ;;  %s1963_s21 = smov 0  }
   0x3 LB: > { %s1329_s22 = sadd.s32 4294967295, %s1922_s21   ;;  %s1977_s23 = sadd.s32 1, %s1922_s21   ;;  %s1922_s21 = sphi %s1963_s21, %s2299_s21   ;;  %s1918_s20 = sphi %s1961_s20, %s2298_s20   ;;  %s1914_s19 = sphi %s1959_s19, %s2297_s19   ;;  %s1910_s18 = sphi %s1957_s18, %s2296_s18  }
   0x4   : > { %s22_s24 = ssub.s32 %s1922_s21, %s1977_s23  ;;  %s25_s25 = sadd.s32 1, %s1918_s20 }
   0x5   : > { %p23_p0 = scmp.eq.s32.totalorder %s22_s24, 0  ;;  %p32_p1 = scmp.ne.s32.totalorder %s1918_s20, %s1914_s19 }
   0x6   : > { %p33_p2 = scmp.eq.s32.totalorder %s1922_s21, 0  ;;  %p38_p3 = scmp.ne.s32.totalorder %s1914_s19, %s1910_s18 }
   0x7   : > { %s1987_s26 = scalar_select %p23_p0, %s1918_s20, %s25_s25  }
   0x8   : > { %p34_p4 = por %p33_p2, %p32_p1  ;;  %p39_p5 = scmp.eq.s32.totalorder %s1329_s22, 0 }
   0x9   : > { %p1767_p6 = scmp.lt.s32.totalorder %s1922_s21, 3  ;;  %s184_s28 = sand.u32 1, %s1918_s20  }
   0xa   : > { %p1992_p7 = por %p39_p5, %p38_p3  ;;  %s1758_s29 = smul.u32 192, %s184_s28 }
   0xb   : > { %s1759_s30 = smul.u32 3072, %s1922_s21  ;;  %p1998_p8 = pnand %p1767_p6, %p34_p4 }
   0xc   : > { %s188_s10 = scalar_lea.vmem [#allocation2], %s1758_s29  ;;  %s2010_s12 = scalar_lea.sflag [#allocation3], %s184_s28 }
   0xd   : > { %s2005_s9 = scalar_lea.hbm %s2287_s0, %s1759_s30  ;;  %s196_s11 = sshll.u32 %s188_s10, 4  ;;  %s2007_s11 = int_to_ptr.vmem [resolvable:$true] %s196_s11 }
   0xe   : > { %s1858_s13 = scalar_lea.hbm %s2005_s9, 3072  ;;  %p1860_p11 = pneg %p1998_p8 }
   0xf   : > { %p1859_p10 = scmp.ne.s32.totalorder %s2005_s9, %s1858_s13  ;;  %s1863_s16 = scalar_lea.hbm %s2287_s0, 9216 }
  0x10   : > { %p1864_p0 = scmp.lt.u32.totalorder %s2005_s9, %s2287_s0  ;;  %p1865_p1 = scmp.lt.u32.totalorder %s1863_s16, %s1858_s13 }
  0x11   : > { %p1861_p12 = pnand %p1860_p11, %p1859_p10  ;;  %p1867_p3 = scmp.lt.u32.totalorder %s1858_s13, %s2005_s9 }
  0x12   : > { %p1866_p2 = por %p1865_p1, %p1864_p0 }
  0x13   : > { %p1862_p13 = pneg %p1861_p12 }
  0x14   : > { %p1868_p4 = por %p1867_p3, %p1866_p2 }
  0x16   : > { %p1869_p5 = pnand %p1868_p4, %p1862_p13 }
  0x18   : > { %1872 = shalt.err (!%p1869_p5)
}
  0x19   : > { %s1873_s24 = scalar_lea.vmem %s2007_s11, 3072  ;;  %s1924_s25 = smov [#allocation2]  }
  0x1a   : > { %p1874_p6 = scmp.ne.s32.totalorder %s2007_s11, %s1873_s24  ;;  %s1878_s28 = sshll.u32 %s1924_s25, 4  ;;  %s1879_s28 = int_to_ptr.vmem [resolvable:$false] %s1878_s28 }
  0x1b   : > { %s1880_s29 = scalar_lea.vmem %s1879_s28, 6144  ;;  %p1881_p9 = scmp.lt.s32.totalorder %s2007_s11, %s1879_s28 }
  0x1c   : > { %p1876_p10 = pnand %p1874_p6, %p1860_p11  ;;  %p1882_p0 = scmp.lt.s32.totalorder %s1880_s29, %s1873_s24 }
  0x1e   : > { %p1877_p12 = pneg %p1876_p10  ;;  %p1883_p1 = por %p1882_p0, %p1881_p9 }
  0x20   : > { %p1884_p2 = pnand %p1883_p1, %p1877_p12 }
  0x22   : > { %1887 = shalt.err (!%p1884_p2)
}
  0x23   : > { %s1925_s30 = smov 192   ;;  %s1926_s7 = smov 12  }
  0x24   : > { %1766 = dma.hbm_to_vmem [thread:$0]  (!%p1998_p8), %s2005_s9, 3072, %s2007_s11, %s2010_s12, %s1925_s30, %s1925_s30, %s1926_s7  }
  0x25   : > { %p204_p11 = scmp.lt.s32.totalorder %s1922_s21, 4  ;;  %p2295_p13 = scmp.ge.s32.totalorder %s1922_s21, 1 }
  0x27   : > { %p205_p3 = pnand %p2295_p13, %p204_p11 }
  0x28   : > { %s210_s8 = sand.u32 (!%p205_p3), 1, %s1914_s19  }
  0x29   : > { %208 = sbr.rel (%p205_p3) target bundleno = 791 (0x317), region = 40  ;;  %s211_s13 = scalar_lea.sflag (!%p205_p3), [#allocation3], %s210_s8 }
  0x2a   : > { %s1760_s10 = smul.u32 (!%p205_p3), 192, %s210_s8 }
  0x2c   : > { %s2042_s14 = scalar_lea.vmem (!%p205_p3), [#allocation2], %s1760_s10 }
  0x30   : > { %1905 = dma.done.wait (%p1992_p7), %s211_s13, 3072  }
  0x31   : > { %1907 = vsyncadd (%p1992_p7), %s211_s13, 4294964224  ;;  %v1802_v0 = vld [vmem:[%s2288_s1 + $0x40] sm:$0xff]   ;;  %v1805_v3 = vld [vmem:[%s2288_s1 + $0x48] sm:$0xff]   ;;  %vm987_vm0 = vcmask 523264   ;;  %s1337_s18 = sshll.u32 %s1329_s22, 4  ;;  %vm1245_vm1 = vcmask 257024  }
  0x32   : > { %v1803_v1 = vld [vmem:[%s2288_s1] sm:$0xff]   ;;  %1438 = vmatprep.subr.bf16.mxu0 %v1802_v0  ;;  %v1806_v4 = vld [vmem:[%s2288_s1 + $0x8] sm:$0xff]   ;;  %v1808_v6 = vld [vmem:[%s2288_s1 + $0x50] sm:$0xff]   ;;  %p243_p7 = scmp.lt.s32.totalorder %s1337_s18, 47 }
  0x33   : > { %v1804_v2 = vld [vmem:[%s2288_s1 + $0x80] sm:$0xff]   ;;  %1439 = vmatpush3.bf16.msra.mxu0 %v1803_v1  ;;  %v1807_v5 = vld [vmem:[%s2288_s1 + $0x88] sm:$0xff]   ;;  %v1809_v7 = vld [vmem:[%s2288_s1 + $0x10] sm:$0xff]  }
  0x34   : > { %1574 = vmatprep.subr.bf16.mxu1 %v1804_v2  ;;  %1440 = vmatprep.subr.bf16.mxu0 %v1805_v3  ;;  %v1810_v8 = vld [vmem:[%s2288_s1 + $0x90] sm:$0xff]   ;;  %v1811_v9 = vld [vmem:[%s2288_s1 + $0x58] sm:$0xff]   ;;  %v1814_v12 = vld [vmem:[%s2288_s1 + $0x60] sm:$0xff]   ;;  %s2301_s18 = smov (!%p243_p7, %s1337_s18), 47 }
  0x35   : > { %1575 = vmatpush3.bf16.msra.mxu1 %v1804_v2  ;;  %v1812_v10 = vld [vmem:[%s2288_s1 + $0x18] sm:$0xff]   ;;  %v1816_v13 = vld [vmem:[%s2288_s1 + $0xa0] sm:$0xff]   ;;  %v1817_v15 = vld [vmem:[%s2288_s1 + $0x68] sm:$0xff]  }
  0x36   : > { %1576 = vmatprep.subr.bf16.mxu1 %v1807_v5  ;;  %v1813_v11 = vld [vmem:[%s2288_s1 + $0x98] sm:$0xff]   ;;  %v1815_v14 = vld [vmem:[%s2288_s1 + $0x20] sm:$0xff]   ;;  %v1819_v16 = vld [vmem:[%s2288_s1 + $0xa8] sm:$0xff]  }
  0x37   : > { %1441 = vmatpush3.bf16.msra.mxu0 %v1806_v4  ;;  %v1818_v17 = vld [vmem:[%s2288_s1 + $0x28] sm:$0xff]   ;;  %v1820_v18 = vld [vmem:[%s2288_s1 + $0x70] sm:$0xff]   ;;  %v1823_v21 = vld [vmem:[%s2288_s1 + $0x78] sm:$0xff]  }
  0x38   : > { %1442 = vmatprep.subr.bf16.mxu0 %v1808_v6  ;;  %v1821_v19 = vld [vmem:[%s2288_s1 + $0x30] sm:$0xff]   ;;  %v1825_v22 = vld [vmem:[%s2288_s1 + $0xb8] sm:$0xff]   ;;  %v1826_v26 = vld [vmem:[%s2042_s14] ss:$12 sps:$4 sm:$0xff]  }
  0x39   : > { %1577 = vmatpush3.bf16.msra.mxu1 %v1807_v5  ;;  %v1822_v20 = vld [vmem:[%s2288_s1 + $0xb0] sm:$0xff]   ;;  %v1824_v25 = vld [vmem:[%s2288_s1 + $0x38] sm:$0xff]   ;;  %v1830_v28 = vld [vmem:[%s2042_s14 + $0x20] ss:$12 sps:$4 sm:$0xff]  }
  0x3a   : > { %1578 = vmatprep.subr.bf16.mxu1 %v1810_v8  ;;  %v1828_v23 = vld [vmem:[%s2042_s14 + $0x4] ss:$12 sps:$4 sm:$0xff]   ;;  %v1829_v24 = vld [vmem:[%s2042_s14 + $0x8] ss:$12 sps:$4 sm:$0xff]   ;;  %v798_v37 = vld [vmem:[%s2289_s2 + $0x18] sm:$0xff] }
  0x3b   : > { %1443 = vmatpush3.bf16.msra.mxu0 %v1809_v7  ;;  %633 = vmatprep.mubr.bf16.mxu0 %v1828_v23  ;;  %v1831_v27 = vld [vmem:[%s2042_s14 + $0x1c] ss:$12 sps:$4 sm:$0xff]   ;;  %v1837_v29 = vld [vmem:[%s2042_s14 + $0x38] ss:$12 sps:$4 sm:$0xff]   ;;  %v1834_v31 = vld [vmem:[%s2042_s14 + $0x34] ss:$12 sps:$4 sm:$0xff]  }
  0x3c   : > { %1444 = vmatprep.subr.bf16.mxu0 %v1811_v9  ;;  %1590 = vmatprep.mubr.bf16.mxu1 %v1829_v24  ;;  %v1833_v30 = vld [vmem:[%s2042_s14 + $0x18] ss:$12 sps:$4 sm:$0xff]   ;;  %v1838_v32 = vld [vmem:[%s2042_s14 + $0x50] ss:$12 sps:$4 sm:$0xff]   ;;  %v1845_v33 = vld [vmem:[%s2042_s14 + $0x68] ss:$12 sps:$4 sm:$0xff]  }
  0x3d   : > { %1579 = vmatpush3.bf16.msra.mxu1 %v1810_v8  ;;  %v795_v34 = vld [vmem:[%s2289_s2] sm:$0xff]  ;;  %v796_v35 = vld [vmem:[%s2289_s2 + $0x8] sm:$0xff]  ;;  %v797_v36 = vld [vmem:[%s2289_s2 + $0x10] sm:$0xff] }
  0x3e   : > { %1580 = vmatprep.subr.bf16.mxu1 %v1813_v11  ;;  %v1702_v38 = vpack.c.bf16 %v796_v35, %v795_v34  ;;  %v1706_v39 = vpack.c.bf16 %v798_v37, %v797_v36  ;;  %v799_v40 = vld [vmem:[%s2289_s2 + $0x20] sm:$0xff]  ;;  %v800_v41 = vld [vmem:[%s2289_s2 + $0x28] sm:$0xff]  ;;  %v1836_v42 = vld [vmem:[%s2042_s14 + $0x30] ss:$12 sps:$4 sm:$0xff]  }
  0x3f   : > { %1445 = vmatpush3.bf16.msra.mxu0 %v1812_v10  ;;  %v1839_v43 = vld [vmem:[%s2042_s14 + $0x4c] ss:$12 sps:$4 sm:$0xff]   ;;  %v1710_v45 = vpack.c.bf16 %v800_v41, %v799_v40  ;;  %v801_v47 = vld [vmem:[%s2289_s2 + $0x30] sm:$0xff]  ;;  %v803_v50 = vld [vmem:[%s2289_s2 + $0x40] sm:$0xff] }
  0x40   : > { %1446 = vmatprep.subr.bf16.mxu0 %v1814_v12  ;;  %v1846_v44 = vld [vmem:[%s2042_s14 + $0x80] ss:$12 sps:$4 sm:$0xff]   ;;  %v1853_v46 = vld [vmem:[%s2042_s14 + $0x98] ss:$12 sps:$4 sm:$0xff]   ;;  %v1841_v52 = vld [vmem:[%s2042_s14 + $0x48] ss:$12 sps:$4 sm:$0xff]  }
  0x41   : > { %1581 = vmatpush3.bf16.msra.mxu1 %v1813_v11  ;;  %v802_v48 = vld [vmem:[%s2289_s2 + $0x38] sm:$0xff]  ;;  %v804_v51 = vld [vmem:[%s2289_s2 + $0x48] sm:$0xff]  ;;  %v1842_v53 = vld [vmem:[%s2042_s14 + $0x64] ss:$12 sps:$4 sm:$0xff]  }
  0x42   : > { %1582 = vmatprep.subr.bf16.mxu1 %v1816_v13  ;;  %v1714_v49 = vpack.c.bf16 %v802_v48, %v801_v47  ;;  %v1854_v54 = vld [vmem:[%s2042_s14 + $0xb0] ss:$12 sps:$4 sm:$0xff]   ;;  %v1718_v55 = vpack.c.bf16 %v804_v51, %v803_v50  ;;  %v1844_v59 = vld [vmem:[%s2042_s14 + $0x60] ss:$12 sps:$4 sm:$0xff]   ;;  %v1849_v61 = vld [vmem:[%s2042_s14 + $0x78] ss:$12 sps:$4 sm:$0xff]  }
  0x43   : > { %1447 = vmatpush3.bf16.msra.mxu0 %v1815_v14  ;;  %v805_v56 = vld [vmem:[%s2289_s2 + $0x50] sm:$0xff]  ;;  %v806_v57 = vld [vmem:[%s2289_s2 + $0x58] sm:$0xff]  ;;  %v807_v2 = vld [vmem:[%s2289_s2 + $0x60] sm:$0xff] }
  0x44   : > { %1448 = vmatprep.subr.bf16.mxu0 %v1817_v15  ;;  %v1722_v58 = vpack.c.bf16 %v806_v57, %v805_v56  ;;  %v1847_v60 = vld [vmem:[%s2042_s14 + $0x7c] ss:$12 sps:$4 sm:$0xff]   ;;  %v1850_v62 = vld [vmem:[%s2042_s14 + $0x94] ss:$12 sps:$4 sm:$0xff]   ;;  %v1855_v0 = vld [vmem:[%s2042_s14 + $0xac] ss:$12 sps:$4 sm:$0xff]  }
  0x45   : > { %1583 = vmatpush3.bf16.msra.mxu1 %v1816_v13  ;;  %v1852_v63 = vld [vmem:[%s2042_s14 + $0x90] ss:$12 sps:$4 sm:$0xff]   ;;  %v1857_v1 = vld [vmem:[%s2042_s14 + $0xa8] ss:$12 sps:$4 sm:$0xff]   ;;  %v979_v8 = vld [vmem:[%s2291_s4] sm:$0xff]  ;;  %s1338_s14 = sshll.u32 %s2301_s18, 2 }
  0x46   : > { %1584 = vmatprep.subr.bf16.mxu1 %v1819_v16  ;;  %v808_v3 = vld [vmem:[%s2289_s2 + $0x68] sm:$0xff]  ;;  %v809_v5 = vld [vmem:[%s2289_s2 + $0x70] sm:$0xff]  ;;  %v810_v6 = vld [vmem:[%s2289_s2 + $0x78] sm:$0xff]  ;;  %s2240_s25 = scalar_lea.vmem %s2292_s5, %s1338_s14 }
  0x47   : > { %1449 = vmatpush3.bf16.msra.mxu0 %v1818_v17  ;;  %v1726_v4 = vpack.c.bf16 %v808_v3, %v807_v2  ;;  %v1730_v7 = vpack.c.bf16 %v810_v6, %v809_v5  ;;  %v980_v9 = vld [vmem:[%s2291_s4 + $0x8] sm:$0xff]  ;;  %v981_v10 = vld [vmem:[%s2291_s4 + $0x10] sm:$0xff]  ;;  %v982_v12 = vld [vmem:[%s2291_s4 + $0x18] sm:$0xff] }
  0x48   : > { %1450 = vmatprep.subr.bf16.mxu0 %v1820_v18  ;;  %v1734_v11 = vpack.c.bf16 %v980_v9, %v979_v8  ;;  %v1738_v13 = vpack.c.bf16 %v982_v12, %v981_v10  ;;  %v983_v14 = vld [vmem:[%s2291_s4 + $0x20] sm:$0xff]  ;;  %v984_v15 = vld [vmem:[%s2291_s4 + $0x28] sm:$0xff] }
  0x49   : > { %1585 = vmatpush3.bf16.msra.mxu1 %v1819_v16  ;;  %v1742_v16 = vpack.c.bf16 %v984_v15, %v983_v14 }
  0x4a   : > { %1586 = vmatprep.subr.bf16.mxu1 %v1822_v20 }
  0x4b   : > { %1451 = vmatpush3.bf16.msra.mxu0 %v1821_v19 }
  0x4c   : > { %1452 = vmatprep.subr.bf16.mxu0 %v1823_v21 }
  0x4d   : > { %1587 = vmatpush3.bf16.msra.mxu1 %v1822_v20 }
  0x4e   : > { %1588 = vmatprep.subr.bf16.mxu1 %v1825_v22 }
  0x4f   : > { %1453 = vmatpush3.bf16.msra.mxu0 %v1824_v25 }
  0x50   : > { %1735 = vmatprep.subr.bf16.mxu0 %v1734_v11 }
  0x51   : > { %1589 = vmatpush3.bf16.msra.mxu1 %v1825_v22 }
  0x52   : > { %634 = vmatmul.mubr.bf16.vlgmr.msra.gmra.mrb[0].mxu0 %v1826_v26  ;;  %1703 = vmatprep.subr.bf16.mxu1 %v1702_v38 }
  0x53   : > { %641 = vmatprep.mubr.bf16.mxu0 %v1831_v27  ;;  %1737 = vmatpush3.bf16.msra.mxu0 %v1734_v11 }
  0x54   : > { %1591 = vmatmul.mubr.bf16.vlgmr.msra.gmra.mrb[0].mxu1 %v1830_v28  ;;  %1739 = vmatprep.subr.bf16.mxu0 %v1738_v13 }
  0x55   : > { %1594 = vmatprep.mubr.bf16.mxu1 %v1837_v29  ;;  %1705 = vmatpush3.bf16.msra.mxu1 %v1702_v38 }
  0x56   : > { %1707 = vmatprep.subr.bf16.mxu1 %v1706_v39 }
  0x57   : > { %1741 = vmatpush3.bf16.msra.mxu0 %v1738_v13 }
  0x58   : > { %1743 = vmatprep.subr.bf16.mxu0 %v1742_v16 }
  0x59   : > { %1709 = vmatpush3.bf16.msra.mxu1 %v1706_v39 }
  0x5a   : > { %642 = vmatmul.mubr.bf16.gmra.mrb[4].mxu0 %v1833_v30  ;;  %1711 = vmatprep.subr.bf16.mxu1 %v1710_v45 }
  0x5b   : > { %649 = vmatprep.mubr.bf16.mxu0 %v1834_v31  ;;  %1745 = vmatpush3.bf16.msra.mxu0 %v1742_v16 }
  0x5c   : > { %1595 = vmatmul.mubr.bf16.gmra.mrb[4].mxu1 %v1838_v32 }
  0x5d   : > { %1598 = vmatprep.mubr.bf16.mxu1 %v1845_v33  ;;  %1713 = vmatpush3.bf16.msra.mxu1 %v1710_v45 }
  0x5e   : > { %1715 = vmatprep.subr.bf16.mxu1 %v1714_v49 }
  0x61   : > { %1717 = vmatpush3.bf16.msra.mxu1 %v1714_v49 }
  0x62   : > { %650 = vmatmul.mubr.bf16.gmra.mrb[8].mxu0 %v1836_v42  ;;  %1719 = vmatprep.subr.bf16.mxu1 %v1718_v55 }
  0x63   : > { %657 = vmatprep.mubr.bf16.mxu0 %v1839_v43 }
  0x64   : > { %1599 = vmatmul.mubr.bf16.gmra.mrb[8].mxu1 %v1846_v44 }
  0x65   : > { %1602 = vmatprep.mubr.bf16.mxu1 %v1853_v46  ;;  %1721 = vmatpush3.bf16.msra.mxu1 %v1718_v55 }
  0x66   : > { %1723 = vmatprep.subr.bf16.mxu1 %v1722_v58 }
  0x69   : > { %1725 = vmatpush3.bf16.msra.mxu1 %v1722_v58 }
  0x6a   : > { %658 = vmatmul.mubr.bf16.gmra.mrb[12].mxu0 %v1841_v52  ;;  %1727 = vmatprep.subr.bf16.mxu1 %v1726_v4 }
  0x6b   : > { %665 = vmatprep.mubr.bf16.mxu0 %v1842_v53 }
  0x6c   : > { %1603 = vmatmul.mubr.bf16.gmra.mrb[12].mxu1 %v1854_v54 }
  0x6d   : > { %1729 = vmatpush3.bf16.msra.mxu1 %v1726_v4 }
  0x6e   : > { %1731 = vmatprep.subr.bf16.mxu1 %v1730_v7 }
  0x71   : > { %1733 = vmatpush3.bf16.msra.mxu1 %v1730_v7 }
  0x72   : > { %666 = vmatmul.mubr.bf16.gmra.mrb[16].mxu0 %v1844_v59  ;;  %1750 = vmatprep.subr.bf16.mxu1 %v1734_v11 }
  0x73   : > { %673 = vmatprep.mubr.bf16.mxu0 %v1847_v60 }
  0x7a   : > { %674 = vmatmul.mubr.bf16.gmra.mrb[20].mxu0 %v1849_v61 }
  0x7b   : > { %681 = vmatprep.mubr.bf16.mxu0 %v1850_v62 }
  0x82   : > { %682 = vmatmul.mubr.bf16.gmra.mrb[24].mxu0 %v1852_v63 }
  0x83   : > { %689 = vmatprep.mubr.bf16.mxu0 %v1855_v0 }
  0x8a   : > { %690 = vmatmul.mubr.bf16.gmra.mrb[28].mxu0 %v1857_v1 }
 0x125   : > { %v1454_v17 = vpop.f32.mrb[0].mxu0 }
 0x126   : > { %v1455_v18 = vpop.f32.mrb[1].mxu0 }
 0x127   : > { %v1456_v19 = vadd.f32 %v1455_v18, %v1454_v17  ;;  %v1457_v20 = vpop.f32.mrb[2].mxu0  ;;  %v1592_v21 = vpop.f32.mrb[0].mxu1 }
 0x128   : > { %v1458_v22 = vpop.f32.mrb[3].mxu0  ;;  %v732_v23 = vpop.f32.mrb[1].mxu1 }
 0x129   : > { %v1459_v24 = vadd.f32 %v1458_v22, %v1457_v20  ;;  %v733_v25 = vadd.f32 %v1456_v19, %v732_v23  ;;  %v1593_v26 = vpop.f32.mrb[2].mxu1 }
 0x12a   : > { %v735_v27 = vpop.f32.mrb[3].mxu1 }
 0x12b   : > { %v736_v28 = vadd.f32 %v1459_v24, %v735_v27  ;;  %1638 = vmatprep.mubr.f32.mxu1 %v733_v25 }
 0x12d   : > { %v1460_v29 = vpop.f32.mrb[4].mxu0  ;;  %1639 = vmatmul.mubr.f32.vlgmr.msra.gmra.mrb[16].mxu1 %v736_v28 }
 0x12e   : > { %v1461_v30 = vpop.f32.mrb[5].mxu0  ;;  %1754 = vmatpush3.bf16.msra.mxu1 %v1734_v11 }
 0x12f   : > { %v1462_v31 = vadd.f32 %v1461_v30, %v1460_v29  ;;  %v1463_v32 = vpop.f32.mrb[6].mxu0  ;;  %v1596_v33 = vpop.f32.mrb[4].mxu1  ;;  %1751 = vmatprep.subr.bf16.mxu1 %v1738_v13 }
 0x130   : > { %v1464_v34 = vpop.f32.mrb[7].mxu0  ;;  %v748_v35 = vpop.f32.mrb[5].mxu1 }
 0x131   : > { %v741_v36 = vadd.f32 %v1592_v21, %v1462_v31  ;;  %v1465_v37 = vadd.f32 %v1464_v34, %v1463_v32  ;;  %v1597_v38 = vpop.f32.mrb[6].mxu1  ;;  %v986_v34 = vld [vmem:[%s2291_s4 + $0x38] sm:$0xff] }
 0x132   : > { %v751_v39 = vpop.f32.mrb[7].mxu1  ;;  %1755 = vmatpush3.bf16.msra.mxu1 %v1738_v13 }
 0x133   : > { %v744_v40 = vadd.f32 %v1593_v26, %v1465_v37  ;;  %1641 = vmatprep.mubr.f32.mxu1 %v741_v36  ;;  %1752 = vmatprep.subr.bf16.mxu1 %v1742_v16  ;;  %v1387_v36 = vld [vmem:[%s2290_s3] ss:$0 sm:$0xff] }
 0x135   : > { %v1466_v41 = vpop.f32.mrb[8].mxu0  ;;  %1642 = vmatmul.mubr.f32.gmra.mrb[18].mxu1 %v744_v40 }
 0x136   : > { %v1467_v42 = vpop.f32.mrb[9].mxu0  ;;  %1756 = vmatpush3.bf16.msra.mxu1 %v1742_v16 }
 0x137   : > { %v1468_v43 = vadd.f32 %v1467_v42, %v1466_v41  ;;  %v1469_v44 = vpop.f32.mrb[10].mxu0  ;;  %v1600_v45 = vpop.f32.mrb[8].mxu1 }
 0x138   : > { %v1470_v46 = vpop.f32.mrb[11].mxu0  ;;  %v764_v47 = vpop.f32.mrb[9].mxu1 }
 0x139   : > { %v1471_v48 = vadd.f32 %v1470_v46, %v1469_v44  ;;  %v749_v49 = vadd.f32 %v1468_v43, %v748_v35  ;;  %v1601_v50 = vpop.f32.mrb[10].mxu1 }
 0x13a   : > { %v767_v51 = vpop.f32.mrb[11].mxu1 }
 0x13b   : > { %v752_v52 = vadd.f32 %v1471_v48, %v751_v39  ;;  %1644 = vmatprep.mubr.f32.mxu1 %v749_v49 }
 0x13d   : > { %v1472_v53 = vpop.f32.mrb[12].mxu0  ;;  %1645 = vmatmul.mubr.f32.gmra.mrb[20].mxu1 %v752_v52 }
 0x13e   : > { %v1473_v54 = vpop.f32.mrb[13].mxu0 }
 0x13f   : > { %v1474_v55 = vadd.f32 %v1473_v54, %v1472_v53  ;;  %v1475_v56 = vpop.f32.mrb[14].mxu0  ;;  %v1604_v57 = vpop.f32.mrb[12].mxu1 }
 0x140   : > { %v1476_v58 = vpop.f32.mrb[15].mxu0  ;;  %v780_v59 = vpop.f32.mrb[13].mxu1 }
 0x141   : > { %v757_v60 = vadd.f32 %v1596_v33, %v1474_v55  ;;  %v1477_v61 = vadd.f32 %v1476_v58, %v1475_v56  ;;  %v1605_v62 = vpop.f32.mrb[14].mxu1  ;;  %v985_v33 = vld [vmem:[%s2291_s4 + $0x30] sm:$0xff] }
 0x142   : > { %v783_v63 = vpop.f32.mrb[15].mxu1  ;;  %v1746_v35 = vpack.c.bf16 %v986_v34, %v985_v33 }
 0x143   : > { %v760_v0 = vadd.f32 %v1597_v38, %v1477_v61  ;;  %1647 = vmatprep.mubr.f32.mxu1 %v757_v60 }
 0x144   : > { %1747 = vmatprep.subr.bf16.mxu0 %v1746_v35  ;;  %1753 = vmatprep.subr.bf16.mxu1 %v1746_v35 }
 0x145   : > { %v1478_v1 = vpop.f32.mrb[16].mxu0  ;;  %1648 = vmatmul.mubr.f32.gmra.mrb[22].mxu1 %v760_v0  ;;  %1749 = vmatpush3.bf16.msra.mxu0 %v1746_v35 }
 0x146   : > { %v1479_v2 = vpop.f32.mrb[17].mxu0  ;;  %1757 = vmatpush3.bf16.msra.mxu1 %v1746_v35 }
 0x147   : > { %v1480_v3 = vadd.f32 %v1479_v2, %v1478_v1  ;;  %v1481_v4 = vpop.f32.mrb[18].mxu0 }
 0x148   : > { %v1482_v5 = vpop.f32.mrb[19].mxu0 }
 0x149   : > { %v1483_v6 = vadd.f32 %v1482_v5, %v1481_v4  ;;  %v765_v7 = vadd.f32 %v1480_v3, %v764_v47 }
 0x14b   : > { %v768_v8 = vadd.f32 %v1483_v6, %v767_v51  ;;  %1650 = vmatprep.mubr.f32.mxu1 %v765_v7 }
 0x14d   : > { %v1484_v9 = vpop.f32.mrb[20].mxu0  ;;  %1651 = vmatmul.mubr.f32.gmra.mrb[24].mxu1 %v768_v8 }
 0x14e   : > { %v1485_v10 = vpop.f32.mrb[21].mxu0 }
 0x14f   : > { %v1486_v11 = vadd.f32 %v1485_v10, %v1484_v9  ;;  %v1487_v12 = vpop.f32.mrb[22].mxu0 }
 0x150   : > { %v1488_v13 = vpop.f32.mrb[23].mxu0 }
 0x151   : > { %v773_v14 = vadd.f32 %v1600_v45, %v1486_v11  ;;  %v1489_v15 = vadd.f32 %v1488_v13, %v1487_v12 }
 0x153   : > { %v776_v16 = vadd.f32 %v1601_v50, %v1489_v15  ;;  %1653 = vmatprep.mubr.f32.mxu1 %v773_v14 }
 0x155   : > { %v1490_v17 = vpop.f32.mrb[24].mxu0  ;;  %1654 = vmatmul.mubr.f32.gmra.mrb[26].mxu1 %v776_v16 }
 0x156   : > { %v1491_v18 = vpop.f32.mrb[25].mxu0 }
 0x157   : > { %v1492_v19 = vadd.f32 %v1491_v18, %v1490_v17  ;;  %v1493_v20 = vpop.f32.mrb[26].mxu0 }
 0x158   : > { %v1494_v21 = vpop.f32.mrb[27].mxu0 }
 0x159   : > { %v1495_v22 = vadd.f32 %v1494_v21, %v1493_v20  ;;  %v781_v23 = vadd.f32 %v1492_v19, %v780_v59 }
 0x15b   : > { %v784_v24 = vadd.f32 %v1495_v22, %v783_v63  ;;  %1656 = vmatprep.mubr.f32.mxu1 %v781_v23 }
 0x15d   : > { %v1496_v25 = vpop.f32.mrb[28].mxu0  ;;  %1657 = vmatmul.mubr.f32.gmra.mrb[28].mxu1 %v784_v24 }
 0x15e   : > { %v1497_v26 = vpop.f32.mrb[29].mxu0 }
 0x15f   : > { %v1498_v27 = vadd.f32 %v1497_v26, %v1496_v25  ;;  %v1499_v28 = vpop.f32.mrb[30].mxu0 }
 0x160   : > { %v1500_v29 = vpop.f32.mrb[31].mxu0 }
 0x161   : > { %v789_v30 = vadd.f32 %v1604_v57, %v1498_v27  ;;  %v1501_v31 = vadd.f32 %v1500_v29, %v1499_v28 }
 0x163   : > { %v792_v32 = vadd.f32 %v1605_v62, %v1501_v31  ;;  %1659 = vmatprep.mubr.f32.mxu1 %v789_v30 }
 0x165   : > { %1660 = vmatmul.mubr.f32.gmra.mrb[30].mxu1 %v792_v32 }
 0x200   : > { %v1640_v37 = vpop.f32.mrb[16].mxu1 }
 0x201   : > { %v890_v38 = vadd.f32 %v1640_v37, %v1387_v36  ;;  %v884_v39 = vpop.f32.mrb[17].mxu1 }
 0x202   : > { %v885_v40 = vadd.f32 %v1387_v36, %v884_v39 }
 0x203   : > { %v964_v42 = vmax.f32 %v890_v38, 0.0 }
 0x204   : > { %v963_v41 = vmax.f32 %v885_v40, 0.0 }
 0x206   : > { %1678 = vmatprep.mubr.msk.f32.mxu0 %vm987_vm0, %v963_v41 }
 0x207   : > { %1679 = vmatmul.mubr.msk.f32.vlgmr.msra.gmra.mrb[32].mxu0 %vm987_vm0, %v964_v42 }
 0x208   : > { %v1643_v43 = vpop.f32.mrb[18].mxu1 }
 0x209   : > { %v900_v44 = vadd.f32 %v1643_v43, %v1387_v36  ;;  %v894_v45 = vpop.f32.mrb[19].mxu1 }
 0x20a   : > { %v895_v46 = vadd.f32 %v1387_v36, %v894_v45 }
 0x20b   : > { %v966_v48 = vmax.f32 %v900_v44, 0.0 }
 0x20c   : > { %v965_v47 = vmax.f32 %v895_v46, 0.0 }
 0x20e   : > { %1681 = vmatprep.mubr.msk.f32.mxu0 %vm987_vm0, %v965_v47 }
 0x20f   : > { %1682 = vmatmul.mubr.msk.f32.gmra.mrb[34].mxu0 %vm987_vm0, %v966_v48 }
 0x210   : > { %v1646_v49 = vpop.f32.mrb[20].mxu1 }
 0x211   : > { %v910_v50 = vadd.f32 %v1646_v49, %v1387_v36  ;;  %v904_v51 = vpop.f32.mrb[21].mxu1 }
 0x212   : > { %v905_v52 = vadd.f32 %v1387_v36, %v904_v51 }
 0x213   : > { %v968_v54 = vmax.f32 %v910_v50, 0.0 }
 0x214   : > { %v967_v53 = vmax.f32 %v905_v52, 0.0 }
 0x216   : > { %1684 = vmatprep.mubr.msk.f32.mxu0 %vm987_vm0, %v967_v53 }
 0x217   : > { %1685 = vmatmul.mubr.msk.f32.gmra.mrb[36].mxu0 %vm987_vm0, %v968_v54 }
 0x218   : > { %v1649_v55 = vpop.f32.mrb[22].mxu1 }
 0x219   : > { %v920_v56 = vadd.f32 %v1649_v55, %v1387_v36  ;;  %v914_v57 = vpop.f32.mrb[23].mxu1 }
 0x21a   : > { %v915_v58 = vadd.f32 %v1387_v36, %v914_v57 }
 0x21b   : > { %v970_v60 = vmax.f32 %v920_v56, 0.0 }
 0x21c   : > { %v969_v59 = vmax.f32 %v915_v58, 0.0 }
 0x21e   : > { %1687 = vmatprep.mubr.msk.f32.mxu0 %vm987_vm0, %v969_v59 }
 0x21f   : > { %1688 = vmatmul.mubr.msk.f32.gmra.mrb[38].mxu0 %vm987_vm0, %v970_v60 }
 0x220   : > { %v1652_v61 = vpop.f32.mrb[24].mxu1 }
 0x221   : > { %v930_v62 = vadd.f32 %v1652_v61, %v1387_v36  ;;  %v924_v63 = vpop.f32.mrb[25].mxu1 }
 0x222   : > { %v925_v0 = vadd.f32 %v1387_v36, %v924_v63 }
 0x223   : > { %v972_v2 = vmax.f32 %v930_v62, 0.0 }
 0x224   : > { %v971_v1 = vmax.f32 %v925_v0, 0.0 }
 0x226   : > { %1690 = vmatprep.mubr.msk.f32.mxu1 %vm987_vm0, %v971_v1 }
 0x227   : > { %1691 = vmatmul.mubr.msk.f32.vlgmr.msra.gmra.mrb[32].mxu1 %vm987_vm0, %v972_v2 }
 0x228   : > { %v1655_v3 = vpop.f32.mrb[26].mxu1 }
 0x229   : > { %v940_v4 = vadd.f32 %v1655_v3, %v1387_v36  ;;  %v934_v5 = vpop.f32.mrb[27].mxu1 }
 0x22a   : > { %v935_v6 = vadd.f32 %v1387_v36, %v934_v5 }
 0x22b   : > { %v974_v8 = vmax.f32 %v940_v4, 0.0 }
 0x22c   : > { %v973_v7 = vmax.f32 %v935_v6, 0.0 }
 0x22e   : > { %1693 = vmatprep.mubr.msk.f32.mxu1 %vm987_vm0, %v973_v7 }
 0x22f   : > { %1694 = vmatmul.mubr.msk.f32.gmra.mrb[34].mxu1 %vm987_vm0, %v974_v8 }
 0x230   : > { %v1658_v9 = vpop.f32.mrb[28].mxu1 }
 0x231   : > { %v950_v10 = vadd.f32 %v1658_v9, %v1387_v36  ;;  %v944_v11 = vpop.f32.mrb[29].mxu1 }
 0x232   : > { %v945_v12 = vadd.f32 %v1387_v36, %v944_v11 }
 0x233   : > { %v976_v14 = vmax.f32 %v950_v10, 0.0 }
 0x234   : > { %v975_v13 = vmax.f32 %v945_v12, 0.0 }
 0x236   : > { %1696 = vmatprep.mubr.msk.f32.mxu1 %vm987_vm0, %v975_v13 }
 0x237   : > { %1697 = vmatmul.mubr.msk.f32.gmra.mrb[36].mxu1 %vm987_vm0, %v976_v14 }
 0x238   : > { %v1661_v15 = vpop.f32.mrb[30].mxu1 }
 0x239   : > { %v960_v16 = vadd.f32 %v1661_v15, %v1387_v36  ;;  %v954_v17 = vpop.f32.mrb[31].mxu1 }
 0x23a   : > { %v955_v18 = vadd.f32 %v1387_v36, %v954_v17 }
 0x23b   : > { %v978_v20 = vmax.f32 %v960_v16, 0.0 }
 0x23c   : > { %v977_v19 = vmax.f32 %v955_v18, 0.0 }
 0x23e   : > { %1699 = vmatprep.mubr.msk.f32.mxu1 %vm987_vm0, %v977_v19 }
 0x23f   : > { %1700 = vmatmul.mubr.msk.f32.gmra.mrb[38].mxu1 %vm987_vm0, %v978_v20 }
 0x2da   : > { %v1680_v21 = vpop.f32.mrb[32].mxu0 }
 0x2db   : > { %v1423_v22 = vpack.c.bf16 %v1680_v21, %v1680_v21  ;;  %v1102_v23 = vpop.f32.mrb[33].mxu0 }
 0x2dc   : > { %v1422_v24 = vpack.c.bf16 %v1102_v23, %v1102_v23 }
 0x2dd   : > { %1247 = vst.msk [vmem:[%s2240_s25 + $0x4] sm:$0xf] %vm1245_vm1, %v1423_v22 }
 0x2de   : > { %1246 = vst.msk [vmem:[%s2240_s25] sm:$0xf] %vm1245_vm1, %v1422_v24 }
 0x2e2   : > { %v1683_v25 = vpop.f32.mrb[34].mxu0 }
 0x2e3   : > { %v1425_v26 = vpack.c.bf16 %v1683_v25, %v1683_v25  ;;  %v1112_v27 = vpop.f32.mrb[35].mxu0 }
 0x2e4   : > { %v1424_v28 = vpack.c.bf16 %v1112_v27, %v1112_v27 }
 0x2e5   : > { %1249 = vst.msk [vmem:[%s2240_s25 + $0xc] sm:$0xf] %vm1245_vm1, %v1425_v26 }
 0x2e6   : > { %1248 = vst.msk [vmem:[%s2240_s25 + $0x8] sm:$0xf] %vm1245_vm1, %v1424_v28 }
 0x2ea   : > { %v1686_v29 = vpop.f32.mrb[36].mxu0 }
 0x2eb   : > { %v1427_v30 = vpack.c.bf16 %v1686_v29, %v1686_v29  ;;  %v1122_v31 = vpop.f32.mrb[37].mxu0 }
 0x2ec   : > { %v1426_v32 = vpack.c.bf16 %v1122_v31, %v1122_v31 }
 0x2ed   : > { %1251 = vst.msk [vmem:[%s2240_s25 + $0x14] sm:$0xf] %vm1245_vm1, %v1427_v30 }
 0x2ee   : > { %1250 = vst.msk [vmem:[%s2240_s25 + $0x10] sm:$0xf] %vm1245_vm1, %v1426_v32 }
 0x2f2   : > { %v1689_v33 = vpop.f32.mrb[38].mxu0 }
 0x2f3   : > { %v1429_v34 = vpack.c.bf16 %v1689_v33, %v1689_v33  ;;  %v1132_v35 = vpop.f32.mrb[39].mxu0 }
 0x2f4   : > { %v1428_v36 = vpack.c.bf16 %v1132_v35, %v1132_v35 }
 0x2f5   : > { %1253 = vst.msk [vmem:[%s2240_s25 + $0x1c] sm:$0xf] %vm1245_vm1, %v1429_v34 }
 0x2f6   : > { %1252 = vst.msk [vmem:[%s2240_s25 + $0x18] sm:$0xf] %vm1245_vm1, %v1428_v36 }
 0x2fa   : > { %v1692_v37 = vpop.f32.mrb[32].mxu1 }
 0x2fb   : > { %v1431_v38 = vpack.c.bf16 %v1692_v37, %v1692_v37  ;;  %v1142_v39 = vpop.f32.mrb[33].mxu1 }
 0x2fc   : > { %v1430_v40 = vpack.c.bf16 %v1142_v39, %v1142_v39 }
 0x2fd   : > { %1255 = vst.msk [vmem:[%s2240_s25 + $0x24] sm:$0xf] %vm1245_vm1, %v1431_v38 }
 0x2fe   : > { %1254 = vst.msk [vmem:[%s2240_s25 + $0x20] sm:$0xf] %vm1245_vm1, %v1430_v40 }
 0x302   : > { %v1695_v41 = vpop.f32.mrb[34].mxu1 }
 0x303   : > { %v1433_v42 = vpack.c.bf16 %v1695_v41, %v1695_v41  ;;  %v1152_v43 = vpop.f32.mrb[35].mxu1 }
 0x304   : > { %v1432_v44 = vpack.c.bf16 %v1152_v43, %v1152_v43 }
 0x305   : > { %1257 = vst.msk [vmem:[%s2240_s25 + $0x2c] sm:$0xf] %vm1245_vm1, %v1433_v42 }
 0x306   : > { %1256 = vst.msk [vmem:[%s2240_s25 + $0x28] sm:$0xf] %vm1245_vm1, %v1432_v44 }
 0x30a   : > { %v1698_v45 = vpop.f32.mrb[36].mxu1 }
 0x30b   : > { %v1435_v46 = vpack.c.bf16 %v1698_v45, %v1698_v45  ;;  %v1162_v47 = vpop.f32.mrb[37].mxu1 }
 0x30c   : > { %v1434_v48 = vpack.c.bf16 %v1162_v47, %v1162_v47 }
 0x30d   : > { %1259 = vst.msk [vmem:[%s2240_s25 + $0x34] sm:$0xf] %vm1245_vm1, %v1435_v46 }
 0x30e   : > { %1258 = vst.msk [vmem:[%s2240_s25 + $0x30] sm:$0xf] %vm1245_vm1, %v1434_v48 }
 0x312   : > { %v1701_v49 = vpop.f32.mrb[38].mxu1 }
 0x313   : > { %v1437_v50 = vpack.c.bf16 %v1701_v49, %v1701_v49  ;;  %v1172_v51 = vpop.f32.mrb[39].mxu1 }
 0x314   : > { %v1436_v52 = vpack.c.bf16 %v1172_v51, %v1172_v51 }
 0x315   : > { %1261 = vst.msk [vmem:[%s2240_s25 + $0x3c] sm:$0xf] %vm1245_vm1, %v1437_v50 }
 0x316   : > { %1260 = vst.msk [vmem:[%s2240_s25 + $0x38] sm:$0xf] %vm1245_vm1, %v1436_v52 }
 0x317 PF: > { %p15_p8 = scmp.ge.s32.totalorder %s1977_s23, 5   ;;  %s2296_s18 = smov %s1914_s19 }
 0x318   : > { %s2297_s19 = smov %s1918_s20  ;;  %s2298_s20 = smov %s1987_s26 }
 0x319   : > { %s2299_s21 = smov %s1977_s23  ;;  %17 = sbr.rel (!%p15_p8) target bundleno = 3 (0x3), region = 80 }
 0x320   :  { %1284 = vsyncpa [#allocation3], 1 }
 0x321   :  { %1286 = vsyncpa [#allocation3 + $0x1], 1 }

</bundles_post_ra>
